<compile_context>
chip_gen: v6e
topology: v6e:2x2x1
jax: 0.10.0
libtpu: 0.0.40
codegen_flags: <defaults>
</compile_context>

<pallas_src>
import functools

import jax
import jax.numpy as jnp
import numpy as np
from jax import lax
from jax.experimental import pallas as pl
from jax.experimental.pallas import tpu as pltpu

LAMBDA_CLASS = 0.01
LAMBDA_NOOBJ = 0.1
LAMBDA_OBJ = 0.01
LAMBDA_BOX = 0.8

_CHUNK = 8                       # sublane-rows per inner step (8 * 128 = 1024 rows)
_MAX_CHUNKS = 64                 # up to 64 * 1024 = 65536 rows per grid step
_VMEM_BLOCK_BUDGET = 24 << 20    # cap on double-buffered pred+targ block bytes


def _cdiv(a, b):
    return -(-a // b)


def _yolo_loss_kernel(anch_ref, pred_ref, targ_ref, out_ref, acc_ref,
                      *, n_valid, n_chunks, n_classes, unroll):
    # acc_ref: (6, _CHUNK, 128) persistent accumulators:
    #   [sum_noobj_bce, cnt_noobj, sum_obj_bce, cnt_obj, sum_box_mse, sum_class_ce]
    c = pl.program_id(0)          # row-half (megacore split axis on v7x)
    j = pl.program_id(2)          # row-block index within this half (sequential)
    nb2 = pl.num_programs(2)
    tr = n_chunks * _CHUNK        # sublane-rows per grid step

    @pl.when(j == 0)
    def _init():
        acc_ref[...] = jnp.zeros_like(acc_ref)

    # anchor table for this anchor: [w, h, 1/w, 1/h] -- tiny VMEM constant.
    aw = jnp.broadcast_to(anch_ref[0], (_CHUNK, 128))
    ah = jnp.broadcast_to(anch_ref[1], (_CHUNK, 128))
    inv_aw = jnp.broadcast_to(anch_ref[2], (_CHUNK, 128))
    inv_ah = jnp.broadcast_to(anch_ref[3], (_CHUNK, 128))

    # hoisted per-grid-step constants (JAX does not CSE broadcast_in_dim,
    # so build the iotas exactly once per grid step, not per chunk).
    s_iota = lax.broadcasted_iota(jnp.int32, (_CHUNK, 128), 0)
    l_iota = lax.broadcasted_iota(jnp.int32, (_CHUNK, 128), 1)
    tile_idx = s_iota * 128 + l_iota
    step_row0 = (c * nb2 + j) * tr * 128     # first element-row of this grid step

    def chunk_body(ci, carry):
        s_noobj, c_noobj, s_obj, c_obj, s_box, s_ce = carry
        r0 = pl.multiple_of(ci * _CHUNK, _CHUNK)

        def P(k):
            return pred_ref[k, pl.ds(r0, _CHUNK), :].astype(jnp.float32)

        def T(k):
            return targ_ref[k, pl.ds(r0, _CHUNK), :].astype(jnp.float32)

        # global (per-anchor) element row index of this (8,128) tile
        row = step_row0 + r0 * 128 + tile_idx
        valid = row < n_valid

        tobj = T(0)
        obj_m = valid & (tobj == 1.0)
        noobj_m = valid & (tobj == 0.0)

        # shared BCE-with-logits base: max(x,0) + log1p(exp(-|x|))
        #   noobj target is 0   -> bce = base
        #   obj   target is iou -> bce = base - x0 * iou
        x0 = P(0)
        base = jnp.maximum(x0, 0.0) + jnp.log1p(jnp.exp(-jnp.abs(x0)))

        # decoded boxes + midpoint IoU (sigmoid via tanh: 1 EUP op instead of 2)
        bx = 0.5 * (jnp.tanh(0.5 * P(1)) + 1.0)
        by = 0.5 * (jnp.tanh(0.5 * P(2)) + 1.0)
        pw = P(3)
        ph = P(4)
        bw = jnp.exp(pw) * aw
        bh = jnp.exp(ph) * ah
        tx = T(1)
        ty = T(2)
        tw = T(3)
        th = T(4)

        iw = jnp.maximum(jnp.minimum(bx + bw * 0.5, tx + tw * 0.5)
                         - jnp.maximum(bx - bw * 0.5, tx - tw * 0.5), 0.0)
        ih = jnp.maximum(jnp.minimum(by + bh * 0.5, ty + th * 0.5)
                         - jnp.maximum(by - bh * 0.5, ty - th * 0.5), 0.0)
        inter = iw * ih
        union = bw * bh + jnp.abs(tw * th) - inter + 1e-6   # bw*bh > 0 always
        iou = inter * pl.reciprocal(union, approx=True)

        # box MSE terms (pred xy sigmoided, target wh taken to log space;
        # precomputed anchor reciprocals avoid per-element divides)
        tgt_w = jnp.log(1e-16 + tw * inv_aw)
        tgt_h = jnp.log(1e-16 + th * inv_ah)
        box_sq = ((bx - tx) ** 2 + (by - ty) ** 2
                  + (pw - tgt_w) ** 2 + (ph - tgt_h) ** 2)

        # class cross-entropy: channel axis is the leading (non-vreg) axis, so
        # the max / sum over classes is pure elementwise work (no XLU).
        cls_f = T(5)
        mx = P(5)
        for cc in range(1, n_classes):
            mx = jnp.maximum(mx, P(5 + cc))
        sexp = jnp.exp(P(5) - mx)
        picked = jnp.where(cls_f == 0.0, P(5), 0.0)
        for cc in range(1, n_classes):
            logit = P(5 + cc)
            sexp = sexp + jnp.exp(logit - mx)
            picked = picked + jnp.where(cls_f == float(cc), logit, 0.0)
        ce = jnp.log(sexp) + mx - picked

        s_noobj = s_noobj + jnp.where(noobj_m, base, 0.0)      # sum noobj bce
        c_noobj = c_noobj + noobj_m.astype(jnp.float32)        # cnt noobj
        s_obj = s_obj + jnp.where(obj_m, base - x0 * iou, 0.0)  # sum obj bce
        c_obj = c_obj + obj_m.astype(jnp.float32)              # cnt obj
        s_box = s_box + jnp.where(obj_m, box_sq, 0.0)          # sum box mse
        s_ce = s_ce + jnp.where(obj_m, ce, 0.0)                # sum class ce
        return (s_noobj, c_noobj, s_obj, c_obj, s_box, s_ce)

    # carry accumulators as vreg values; touch VMEM scratch once per grid step
    carry0 = tuple(acc_ref[k] for k in range(6))
    acc = lax.fori_loop(0, n_chunks, chunk_body, carry0, unroll=unroll)
    for k in range(6):
        acc_ref[k] = acc[k]

    # Epilogue: single cross-lane reduction + tiny store per anchor sweep.
    @pl.when(j == nb2 - 1)
    def _finalize():
        parts = [jnp.sum(acc[k], keepdims=True) for k in range(6)]
        out_ref[...] = jnp.concatenate(parts, axis=-1)


def yolo_loss(predictions, target, anchors):
    """predictions: (N, 3, S, S, 5+NC), target: (N, 3, S, S, 6), anchors: (3, 2)."""
    N, A, S, _, C = predictions.shape
    NC = C - 5
    R = N * S * S                       # rows per anchor

    # Stream pred/targ in their native dtype (bf16 producers halve HBM bytes);
    # all math is performed in f32 inside the kernel.
    p_item = jnp.dtype(predictions.dtype).itemsize
    t_item = jnp.dtype(target.dtype).itemsize
    pack = max(1, 4 // min(p_item, t_item))     # sublane packing alignment

    n_chunk_total = _cdiv(R, _CHUNK * 128)
    bytes_per_chunk = (C * p_item + 6 * t_item) * _CHUNK * 128
    cpb = min(_MAX_CHUNKS,
              max(1, _VMEM_BLOCK_BUDGET // (2 * bytes_per_chunk)),
              n_chunk_total)
    cpb = _cdiv(cpb, pack) * pack               # chunks per grid step
    TR = cpb * _CHUNK                           # sublane-rows per grid step

    nb = _cdiv(n_chunk_total, cpb)              # row blocks per anchor
    nsplit = 2 if nb >= 2 else 1                # v7x: split rows across 2 TCs
    nb2 = _cdiv(nb, nsplit)                     # row blocks per (core, anchor)
    RPB = nsplit * nb2 * TR                     # padded sublane-rows per anchor
    RP = RPB * 128                              # padded rows per anchor

    # channel-major, per-anchor layout: rows land in the lane dimension.
    pred = jnp.transpose(predictions, (1, 4, 0, 2, 3)).reshape(A, C, R)
    targ = jnp.transpose(target, (1, 4, 0, 2, 3)).reshape(A, 6, R)
    if RP != R:
        pad = RP - R
        pred = jnp.pad(pred, ((0, 0), (0, 0), (0, pad)))
        targ = jnp.pad(targ, ((0, 0), (0, 0), (0, pad)))
    pred = pred.reshape(A, C, RPB, 128)
    targ = targ.reshape(A, 6, RPB, 128)

    # tiny lane-broadcast anchor table [w, h, 1/w, 1/h]
    a32 = anchors.astype(jnp.float32)
    table = jnp.stack([a32[:, 0], a32[:, 1], 1.0 / a32[:, 0], 1.0 / a32[:, 1]],
                      axis=1)
    anch = jnp.broadcast_to(table.reshape(A, 4, 1, 1), (A, 4, 1, 128))

    unroll = int(min(cpb, 8 if NC <= 16 else 4))
    kernel = functools.partial(_yolo_loss_kernel, n_valid=R, n_chunks=cpb,
                               n_classes=NC, unroll=unroll)

    block_bytes = (C * p_item + 6 * t_item) * TR * 128
    vmem_limit = int(min(48 << 20, max(32 << 20, 2 * block_bytes + (8 << 20))))

    dims = (("parallel", "arbitrary", "arbitrary") if nsplit == 2
            else ("arbitrary", "parallel", "arbitrary"))

    stats = pl.pallas_call(
        kernel,
        out_shape=jax.ShapeDtypeStruct((nsplit, A, 1, 6), jnp.float32),
        grid_spec=pltpu.PrefetchScalarGridSpec(
            num_scalar_prefetch=0,
            grid=(nsplit, A, nb2),
            in_specs=[
                pl.BlockSpec((None, 4, 1, 128), lambda c, a, j: (a, 0, 0, 0)),
                pl.BlockSpec((None, C, TR, 128),
                             lambda c, a, j: (a, 0, c * nb2 + j, 0)),
                pl.BlockSpec((None, 6, TR, 128),
                             lambda c, a, j: (a, 0, c * nb2 + j, 0)),
            ],
            out_specs=pl.BlockSpec((None, None, 1, 6),
                                   lambda c, a, j: (c, a, 0, 0)),
            scratch_shapes=[pltpu.VMEM((6, _CHUNK, 128), jnp.float32)],
        ),
        compiler_params=pltpu.CompilerParams(
            dimension_semantics=dims,
            vmem_limit_bytes=vmem_limit),
    )(anch, pred, targ)

    totals = jnp.sum(stats[:, :, 0, :], axis=(0, 1))
    sum_noobj, cnt_noobj = totals[0], totals[1]
    sum_obj, cnt_obj = totals[2], totals[3]
    sum_box, sum_ce = totals[4], totals[5]

    no_object_loss = sum_noobj / cnt_noobj
    object_loss = sum_obj / cnt_obj
    box_loss = sum_box / (cnt_obj * 4.0)
    class_loss = sum_ce / cnt_obj

    return (LAMBDA_BOX * box_loss + LAMBDA_OBJ * object_loss +
            LAMBDA_NOOBJ * no_object_loss + LAMBDA_CLASS * class_loss)


def yolo_loss_reference(predictions, target, anchors):
    """Pure-JAX reference mirroring the PyTorch YoloLoss forward."""
    N, A, S, _, C = predictions.shape
    p = predictions.astype(jnp.float32).reshape(-1, C)
    t = target.astype(jnp.float32).reshape(-1, 6)
    a = jnp.broadcast_to(anchors.reshape(1, A, 1, 1, 2),
                         (N, A, S, S, 2)).reshape(-1, 2).astype(jnp.float32)

    obj = t[:, 0] == 1.0
    noobj = t[:, 0] == 0.0

    def bce(x, y):
        return jnp.maximum(x, 0.0) - x * y + jnp.log1p(jnp.exp(-jnp.abs(x)))

    no_object_loss = (jnp.sum(jnp.where(noobj, bce(p[:, 0], t[:, 0]), 0.0))
                      / jnp.sum(noobj))

    bx = jax.nn.sigmoid(p[:, 1]); by = jax.nn.sigmoid(p[:, 2])
    bw = jnp.exp(p[:, 3]) * a[:, 0]; bh = jnp.exp(p[:, 4]) * a[:, 1]
    tx, ty, tw, th = t[:, 1], t[:, 2], t[:, 3], t[:, 4]
    iw = jnp.maximum(jnp.minimum(bx + bw / 2, tx + tw / 2)
                     - jnp.maximum(bx - bw / 2, tx - tw / 2), 0.0)
    ih = jnp.maximum(jnp.minimum(by + bh / 2, ty + th / 2)
                     - jnp.maximum(by - bh / 2, ty - th / 2), 0.0)
    inter = iw * ih
    iou = inter / (jnp.abs(bw * bh) + jnp.abs(tw * th) - inter + 1e-6)

    object_loss = (jnp.sum(jnp.where(obj, bce(p[:, 0], iou * t[:, 0]), 0.0))
                   / jnp.sum(obj))

    tgt_w = jnp.log(1e-16 + tw / a[:, 0])
    tgt_h = jnp.log(1e-16 + th / a[:, 1])
    box_sq = ((bx - tx) ** 2 + (by - ty) ** 2
              + (p[:, 3] - tgt_w) ** 2 + (p[:, 4] - tgt_h) ** 2)
    box_loss = jnp.sum(jnp.where(obj, box_sq, 0.0)) / (jnp.sum(obj) * 4.0)

    logits = p[:, 5:]
    lse = jax.nn.logsumexp(logits, axis=-1)
    picked = jnp.take_along_axis(logits, t[:, 5:6].astype(jnp.int32), axis=-1)[:, 0]
    class_loss = jnp.sum(jnp.where(obj, lse - picked, 0.0)) / jnp.sum(obj)

    return (LAMBDA_BOX * box_loss + LAMBDA_OBJ * object_loss +
            LAMBDA_NOOBJ * no_object_loss + LAMBDA_CLASS * class_loss)


if __name__ == "__main__":
    key = jax.random.PRNGKey(0)
    N, A, S, NC = 2, 3, 8, 4          # small shapes: batch=2, 3 anchors, 8x8 grid, 4 classes
    C = 5 + NC
    k1, k2, k3, k4, k5 = jax.random.split(key, 5)

    predictions = jax.random.normal(k1, (N, A, S, S, C), jnp.float32)
    obj_flag = (jax.random.uniform(k2, (N, A, S, S)) < 0.3).astype(jnp.float32)
    xy = jax.random.uniform(k3, (N, A, S, S, 2), minval=0.05, maxval=0.95)
    wh = jax.random.uniform(k4, (N, A, S, S, 2), minval=0.1, maxval=2.0)
    cls = jax.random.randint(k5, (N, A, S, S), 0, NC).astype(jnp.float32)
    target = jnp.concatenate(
        [obj_flag[..., None], xy, wh, cls[..., None]], axis=-1)
    anchors = jnp.array([[1.0, 1.5], [2.0, 1.0], [0.5, 0.75]], jnp.float32)

    # TODO(synk): the PyTorch forward mutates `predictions`/`target` in place
    # (sigmoid / log re-writes); only the returned loss value is reproduced here.

    loss = jax.block_until_ready(yolo_loss(predictions, target, anchors))
    ref = jax.block_until_ready(yolo_loss_reference(predictions, target, anchors))

    assert np.isfinite(float(loss)), "loss is not finite"
    np.testing.assert_allclose(float(loss), float(ref), rtol=1e-4, atol=1e-5)
    print("KERNEL_OK")
</pallas_src>

<mosaic_0001>
module attributes {stable_mosaic.version = 11 : i64} {
  func.func @_yolo_loss_kernel(%arg0: i32, %arg1: i32, %arg2: i32, %arg3: memref<1x4x1x128xf32, #tpu.memory_space<vmem>>, %arg4: memref<1x9x8x128xf32, #tpu.memory_space<vmem>>, %arg5: memref<1x6x8x128xf32, #tpu.memory_space<vmem>>, %arg6: memref<1x1x1x6xf32, #tpu.memory_space<vmem>>, %arg7: memref<6x8x128xf32, #tpu.memory_space<vmem>>) attributes {dimension_semantics = [#tpu.dimension_semantics<arbitrary>, #tpu.dimension_semantics<parallel>, #tpu.dimension_semantics<arbitrary>], iteration_bounds = array<i64: 1, 3, 1>, scalar_prefetch = 0 : i64, scratch_operands = 1 : i64, tpu.core_type = #tpu.core_type<tc>, window_params = [{transform_indices = @transform_0, window_bounds = array<i64: 1, 4, 1, 128>}, {transform_indices = @transform_1, window_bounds = array<i64: 1, 9, 8, 128>}, {transform_indices = @transform_2, window_bounds = array<i64: 1, 6, 8, 128>}, {transform_indices = @transform_3, window_bounds = array<i64: 1, 1, 1, 6>}]} {
    %c0_i32 = arith.constant 0 : i32
    %0 = arith.cmpi eq, %arg2, %c0_i32 : i32
    %1 = arith.extui %0 : i1 to i32
    %c0_i32_0 = arith.constant 0 : i32
    %2 = arith.cmpi ne, %1, %c0_i32_0 : i32
    scf.if %2 {
      %cst_146 = arith.constant 0.000000e+00 : f32
      %280 = vector.broadcast %cst_146 : f32 to vector<6x8x128xf32>
      %c0_147 = arith.constant 0 : index
      %c0_148 = arith.constant 0 : index
      %c0_149 = arith.constant 0 : index
      %281 = vector.load %arg7[%c0_147, %c0_148, %c0_149] : memref<6x8x128xf32, #tpu.memory_space<vmem>>, vector<6x8x128xf32>
      tpu.vector_store %arg7[%c0_147, %c0_148, %c0_149], %280 {strides = array<i32>} : memref<6x8x128xf32, #tpu.memory_space<vmem>>, vector<6x8x128xf32>,
    } else {
    }
    %c0 = arith.constant 0 : index
    %c0_1 = arith.constant 0 : index
    %c0_2 = arith.constant 0 : index
    %c0_3 = arith.constant 0 : index
    %3 = vector.load %arg3[%c0, %c0_1, %c0_2, %c0_3] : memref<1x4x1x128xf32, #tpu.memory_space<vmem>>, vector<1x1x1x128xf32>
    %4 = vector.shape_cast %3 : vector<1x1x1x128xf32> to vector<1x128xf32>
    %5 = vector.shape_cast %4 : vector<1x128xf32> to vector<1x128xf32>
    %6 = vector.broadcast %5 : vector<1x128xf32> to vector<8x128xf32>
    %c0_4 = arith.constant 0 : index
    %c1 = arith.constant 1 : index
    %c0_5 = arith.constant 0 : index
    %c0_6 = arith.constant 0 : index
    %7 = vector.load %arg3[%c0_4, %c1, %c0_5, %c0_6] : memref<1x4x1x128xf32, #tpu.memory_space<vmem>>, vector<1x1x1x128xf32>
    %8 = vector.shape_cast %7 : vector<1x1x1x128xf32> to vector<1x128xf32>
    %9 = vector.shape_cast %8 : vector<1x128xf32> to vector<1x128xf32>
    %10 = vector.broadcast %9 : vector<1x128xf32> to vector<8x128xf32>
    %c0_7 = arith.constant 0 : index
    %c2 = arith.constant 2 : index
    %c0_8 = arith.constant 0 : index
    %c0_9 = arith.constant 0 : index
    %11 = vector.load %arg3[%c0_7, %c2, %c0_8, %c0_9] : memref<1x4x1x128xf32, #tpu.memory_space<vmem>>, vector<1x1x1x128xf32>
    %12 = vector.shape_cast %11 : vector<1x1x1x128xf32> to vector<1x128xf32>
    %13 = vector.shape_cast %12 : vector<1x128xf32> to vector<1x128xf32>
    %14 = vector.broadcast %13 : vector<1x128xf32> to vector<8x128xf32>
    %c0_10 = arith.constant 0 : index
    %c3 = arith.constant 3 : index
    %c0_11 = arith.constant 0 : index
    %c0_12 = arith.constant 0 : index
    %15 = vector.load %arg3[%c0_10, %c3, %c0_11, %c0_12] : memref<1x4x1x128xf32, #tpu.memory_space<vmem>>, vector<1x1x1x128xf32>
    %16 = vector.shape_cast %15 : vector<1x1x1x128xf32> to vector<1x128xf32>
    %17 = vector.shape_cast %16 : vector<1x128xf32> to vector<1x128xf32>
    %18 = vector.broadcast %17 : vector<1x128xf32> to vector<8x128xf32>
    %19 = tpu.iota {dimensions = array<i32: 0>} : vector<8x128xi32>
    %20 = tpu.iota {dimensions = array<i32: 1>} : vector<8x128xi32>
    %c128_i32 = arith.constant 128 : i32
    %21 = vector.broadcast %c128_i32 : i32 to vector<8x128xi32>
    %22 = arith.muli %19, %21 : vector<8x128xi32>
    %23 = arith.addi %22, %20 : vector<8x128xi32>
    %c1_i32 = arith.constant 1 : i32
    %24 = arith.muli %arg0, %c1_i32 : i32
    %25 = arith.addi %24, %arg2 : i32
    %c8_i32 = arith.constant 8 : i32
    %26 = arith.muli %25, %c8_i32 : i32
    %c128_i32_13 = arith.constant 128 : i32
    %27 = arith.muli %26, %c128_i32_13 : i32
    %c0_14 = arith.constant 0 : index
    %c0_15 = arith.constant 0 : index
    %c0_16 = arith.constant 0 : index
    %28 = vector.load %arg7[%c0_14, %c0_15, %c0_16] : memref<6x8x128xf32, #tpu.memory_space<vmem>>, vector<1x8x128xf32>
    %29 = vector.shape_cast %28 : vector<1x8x128xf32> to vector<8x128xf32>
    %c1_17 = arith.constant 1 : index
    %c0_18 = arith.constant 0 : index
    %c0_19 = arith.constant 0 : index
    %30 = vector.load %arg7[%c1_17, %c0_18, %c0_19] : memref<6x8x128xf32, #tpu.memory_space<vmem>>, vector<1x8x128xf32>
    %31 = vector.shape_cast %30 : vector<1x8x128xf32> to vector<8x128xf32>
    %c2_20 = arith.constant 2 : index
    %c0_21 = arith.constant 0 : index
    %c0_22 = arith.constant 0 : index
    %32 = vector.load %arg7[%c2_20, %c0_21, %c0_22] : memref<6x8x128xf32, #tpu.memory_space<vmem>>, vector<1x8x128xf32>
    %33 = vector.shape_cast %32 : vector<1x8x128xf32> to vector<8x128xf32>
    %c3_23 = arith.constant 3 : index
    %c0_24 = arith.constant 0 : index
    %c0_25 = arith.constant 0 : index
    %34 = vector.load %arg7[%c3_23, %c0_24, %c0_25] : memref<6x8x128xf32, #tpu.memory_space<vmem>>, vector<1x8x128xf32>
    %35 = vector.shape_cast %34 : vector<1x8x128xf32> to vector<8x128xf32>
    %c4 = arith.constant 4 : index
    %c0_26 = arith.constant 0 : index
    %c0_27 = arith.constant 0 : index
    %36 = vector.load %arg7[%c4, %c0_26, %c0_27] : memref<6x8x128xf32, #tpu.memory_space<vmem>>, vector<1x8x128xf32>
    %37 = vector.shape_cast %36 : vector<1x8x128xf32> to vector<8x128xf32>
    %c5 = arith.constant 5 : index
    %c0_28 = arith.constant 0 : index
    %c0_29 = arith.constant 0 : index
    %38 = vector.load %arg7[%c5, %c0_28, %c0_29] : memref<6x8x128xf32, #tpu.memory_space<vmem>>, vector<1x8x128xf32>
    %39 = vector.shape_cast %38 : vector<1x8x128xf32> to vector<8x128xf32>
    %c0_i32_30 = arith.constant 0 : i32
    %c8_i32_31 = arith.constant 8 : i32
    %40 = arith.muli %c0_i32_30, %c8_i32_31 : i32
    %41 = tpu.assume_multiple %40, 8 : i32
    %c128_i32_32 = arith.constant 128 : i32
    %42 = arith.muli %41, %c128_i32_32 : i32
    %43 = arith.addi %27, %42 : i32
    %44 = vector.broadcast %43 : i32 to vector<8x128xi32>
    %45 = arith.addi %44, %23 : vector<8x128xi32>
    %c128_i32_33 = arith.constant 128 : i32
    %46 = vector.broadcast %c128_i32_33 : i32 to vector<8x128xi32>
    %47 = arith.cmpi slt, %45, %46 : vector<8x128xi32>
    %c0_34 = arith.constant 0 : index
    %c0_35 = arith.constant 0 : index
    %48 = arith.index_cast %41 : i32 to index
    %c0_36 = arith.constant 0 : index
    %49 = vector.load %arg5[%c0_34, %c0_35, %48, %c0_36] : memref<1x6x8x128xf32, #tpu.memory_space<vmem>>, vector<1x1x8x128xf32>
    %50 = vector.shape_cast %49 : vector<1x1x8x128xf32> to vector<8x128xf32>
    %cst = arith.constant 1.000000e+00 : f32
    %51 = vector.broadcast %cst : f32 to vector<8x128xf32>
    %52 = arith.cmpf oeq, %50, %51 : vector<8x128xf32>
    %53 = arith.andi %47, %52 : vector<8x128xi1>
    %cst_37 = arith.constant 0.000000e+00 : f32
    %54 = vector.broadcast %cst_37 : f32 to vector<8x128xf32>
    %55 = arith.cmpf oeq, %50, %54 : vector<8x128xf32>
    %56 = arith.andi %47, %55 : vector<8x128xi1>
    %c0_38 = arith.constant 0 : index
    %c0_39 = arith.constant 0 : index
    %57 = arith.index_cast %41 : i32 to index
    %c0_40 = arith.constant 0 : index
    %58 = vector.load %arg4[%c0_38, %c0_39, %57, %c0_40] : memref<1x9x8x128xf32, #tpu.memory_space<vmem>>, vector<1x1x8x128xf32>
    %59 = vector.shape_cast %58 : vector<1x1x8x128xf32> to vector<8x128xf32>
    %cst_41 = arith.constant 0.000000e+00 : f32
    %60 = vector.broadcast %cst_41 : f32 to vector<8x128xf32>
    %61 = arith.maximumf %59, %60 : vector<8x128xf32>
    %62 = math.absf %59 : vector<8x128xf32>
    %cst_42 = arith.constant 0.000000e+00 : f32
    %63 = vector.broadcast %cst_42 : f32 to vector<8x128xf32>
    %64 = arith.subf %63, %62 : vector<8x128xf32>
    %65 = math.exp %64 : vector<8x128xf32>
    %66 = math.log1p %65 : vector<8x128xf32>
    %67 = arith.addf %61, %66 : vector<8x128xf32>
    %c0_43 = arith.constant 0 : index
    %c1_44 = arith.constant 1 : index
    %68 = arith.index_cast %41 : i32 to index
    %c0_45 = arith.constant 0 : index
    %69 = vector.load %arg4[%c0_43, %c1_44, %68, %c0_45] : memref<1x9x8x128xf32, #tpu.memory_space<vmem>>, vector<1x1x8x128xf32>
    %70 = vector.shape_cast %69 : vector<1x1x8x128xf32> to vector<8x128xf32>
    %cst_46 = arith.constant 5.000000e-01 : f32
    %71 = vector.broadcast %cst_46 : f32 to vector<8x128xf32>
    %72 = arith.mulf %71, %70 : vector<8x128xf32>
    %73 = math.tanh %72 : vector<8x128xf32>
    %cst_47 = arith.constant 1.000000e+00 : f32
    %74 = vector.broadcast %cst_47 : f32 to vector<8x128xf32>
    %75 = arith.addf %73, %74 : vector<8x128xf32>
    %cst_48 = arith.constant 5.000000e-01 : f32
    %76 = vector.broadcast %cst_48 : f32 to vector<8x128xf32>
    %77 = arith.mulf %76, %75 : vector<8x128xf32>
    %c0_49 = arith.constant 0 : index
    %c2_50 = arith.constant 2 : index
    %78 = arith.index_cast %41 : i32 to index
    %c0_51 = arith.constant 0 : index
    %79 = vector.load %arg4[%c0_49, %c2_50, %78, %c0_51] : memref<1x9x8x128xf32, #tpu.memory_space<vmem>>, vector<1x1x8x128xf32>
    %80 = vector.shape_cast %79 : vector<1x1x8x128xf32> to vector<8x128xf32>
    %cst_52 = arith.constant 5.000000e-01 : f32
    %81 = vector.broadcast %cst_52 : f32 to vector<8x128xf32>
    %82 = arith.mulf %81, %80 : vector<8x128xf32>
    %83 = math.tanh %82 : vector<8x128xf32>
    %cst_53 = arith.constant 1.000000e+00 : f32
    %84 = vector.broadcast %cst_53 : f32 to vector<8x128xf32>
    %85 = arith.addf %83, %84 : vector<8x128xf32>
    %cst_54 = arith.constant 5.000000e-01 : f32
    %86 = vector.broadcast %cst_54 : f32 to vector<8x128xf32>
    %87 = arith.mulf %86, %85 : vector<8x128xf32>
    %c0_55 = arith.constant 0 : index
    %c3_56 = arith.constant 3 : index
    %88 = arith.index_cast %41 : i32 to index
    %c0_57 = arith.constant 0 : index
    %89 = vector.load %arg4[%c0_55, %c3_56, %88, %c0_57] : memref<1x9x8x128xf32, #tpu.memory_space<vmem>>, vector<1x1x8x128xf32>
    %90 = vector.shape_cast %89 : vector<1x1x8x128xf32> to vector<8x128xf32>
    %c0_58 = arith.constant 0 : index
    %c4_59 = arith.constant 4 : index
    %91 = arith.index_cast %41 : i32 to index
    %c0_60 = arith.constant 0 : index
    %92 = vector.load %arg4[%c0_58, %c4_59, %91, %c0_60] : memref<1x9x8x128xf32, #tpu.memory_space<vmem>>, vector<1x1x8x128xf32>
    %93 = vector.shape_cast %92 : vector<1x1x8x128xf32> to vector<8x128xf32>
    %94 = math.exp %90 : vector<8x128xf32>
    %95 = arith.mulf %94, %6 : vector<8x128xf32>
    %96 = math.exp %93 : vector<8x128xf32>
    %97 = arith.mulf %96, %10 : vector<8x128xf32>
    %c0_61 = arith.constant 0 : index
    %c1_62 = arith.constant 1 : index
    %98 = arith.index_cast %41 : i32 to index
    %c0_63 = arith.constant 0 : index
    %99 = vector.load %arg5[%c0_61, %c1_62, %98, %c0_63] : memref<1x6x8x128xf32, #tpu.memory_space<vmem>>, vector<1x1x8x128xf32>
    %100 = vector.shape_cast %99 : vector<1x1x8x128xf32> to vector<8x128xf32>
    %c0_64 = arith.constant 0 : index
    %c2_65 = arith.constant 2 : index
    %101 = arith.index_cast %41 : i32 to index
    %c0_66 = arith.constant 0 : index
    %102 = vector.load %arg5[%c0_64, %c2_65, %101, %c0_66] : memref<1x6x8x128xf32, #tpu.memory_space<vmem>>, vector<1x1x8x128xf32>
    %103 = vector.shape_cast %102 : vector<1x1x8x128xf32> to vector<8x128xf32>
    %c0_67 = arith.constant 0 : index
    %c3_68 = arith.constant 3 : index
    %104 = arith.index_cast %41 : i32 to index
    %c0_69 = arith.constant 0 : index
    %105 = vector.load %arg5[%c0_67, %c3_68, %104, %c0_69] : memref<1x6x8x128xf32, #tpu.memory_space<vmem>>, vector<1x1x8x128xf32>
    %106 = vector.shape_cast %105 : vector<1x1x8x128xf32> to vector<8x128xf32>
    %c0_70 = arith.constant 0 : index
    %c4_71 = arith.constant 4 : index
    %107 = arith.index_cast %41 : i32 to index
    %c0_72 = arith.constant 0 : index
    %108 = vector.load %arg5[%c0_70, %c4_71, %107, %c0_72] : memref<1x6x8x128xf32, #tpu.memory_space<vmem>>, vector<1x1x8x128xf32>
    %109 = vector.shape_cast %108 : vector<1x1x8x128xf32> to vector<8x128xf32>
    %cst_73 = arith.constant 5.000000e-01 : f32
    %110 = vector.broadcast %cst_73 : f32 to vector<8x128xf32>
    %111 = arith.mulf %95, %110 : vector<8x128xf32>
    %112 = arith.addf %77, %111 : vector<8x128xf32>
    %cst_74 = arith.constant 5.000000e-01 : f32
    %113 = vector.broadcast %cst_74 : f32 to vector<8x128xf32>
    %114 = arith.mulf %106, %113 : vector<8x128xf32>
    %115 = arith.addf %100, %114 : vector<8x128xf32>
    %116 = arith.minimumf %112, %115 : vector<8x128xf32>
    %cst_75 = arith.constant 5.000000e-01 : f32
    %117 = vector.broadcast %cst_75 : f32 to vector<8x128xf32>
    %118 = arith.mulf %95, %117 : vector<8x128xf32>
    %119 = arith.subf %77, %118 : vector<8x128xf32>
    %cst_76 = arith.constant 5.000000e-01 : f32
    %120 = vector.broadcast %cst_76 : f32 to vector<8x128xf32>
    %121 = arith.mulf %106, %120 : vector<8x128xf32>
    %122 = arith.subf %100, %121 : vector<8x128xf32>
    %123 = arith.maximumf %119, %122 : vector<8x128xf32>
    %124 = arith.subf %116, %123 : vector<8x128xf32>
    %cst_77 = arith.constant 0.000000e+00 : f32
    %125 = vector.broadcast %cst_77 : f32 to vector<8x128xf32>
    %126 = arith.maximumf %124, %125 : vector<8x128xf32>
    %cst_78 = arith.constant 5.000000e-01 : f32
    %127 = vector.broadcast %cst_78 : f32 to vector<8x128xf32>
    %128 = arith.mulf %97, %127 : vector<8x128xf32>
    %129 = arith.addf %87, %128 : vector<8x128xf32>
    %cst_79 = arith.constant 5.000000e-01 : f32
    %130 = vector.broadcast %cst_79 : f32 to vector<8x128xf32>
    %131 = arith.mulf %109, %130 : vector<8x128xf32>
    %132 = arith.addf %103, %131 : vector<8x128xf32>
    %133 = arith.minimumf %129, %132 : vector<8x128xf32>
    %cst_80 = arith.constant 5.000000e-01 : f32
    %134 = vector.broadcast %cst_80 : f32 to vector<8x128xf32>
    %135 = arith.mulf %97, %134 : vector<8x128xf32>
    %136 = arith.subf %87, %135 : vector<8x128xf32>
    %cst_81 = arith.constant 5.000000e-01 : f32
    %137 = vector.broadcast %cst_81 : f32 to vector<8x128xf32>
    %138 = arith.mulf %109, %137 : vector<8x128xf32>
    %139 = arith.subf %103, %138 : vector<8x128xf32>
    %140 = arith.maximumf %136, %139 : vector<8x128xf32>
    %141 = arith.subf %133, %140 : vector<8x128xf32>
    %cst_82 = arith.constant 0.000000e+00 : f32
    %142 = vector.broadcast %cst_82 : f32 to vector<8x128xf32>
    %143 = arith.maximumf %141, %142 : vector<8x128xf32>
    %144 = arith.mulf %126, %143 : vector<8x128xf32>
    %145 = arith.mulf %95, %97 : vector<8x128xf32>
    %146 = arith.mulf %106, %109 : vector<8x128xf32>
    %147 = math.absf %146 : vector<8x128xf32>
    %148 = arith.addf %145, %147 : vector<8x128xf32>
    %149 = arith.subf %148, %144 : vector<8x128xf32>
    %cst_83 = arith.constant 9.99999997E-7 : f32
    %150 = vector.broadcast %cst_83 : f32 to vector<8x128xf32>
    %151 = arith.addf %149, %150 : vector<8x128xf32>
    %152 = tpu.reciprocal %151 {approx = true} : vector<8x128xf32> -> vector<8x128xf32>
    %153 = arith.mulf %144, %152 : vector<8x128xf32>
    %154 = arith.mulf %106, %14 : vector<8x128xf32>
    %cst_84 = arith.constant 1.000000e-16 : f32
    %155 = vector.broadcast %cst_84 : f32 to vector<8x128xf32>
    %156 = arith.addf %155, %154 : vector<8x128xf32>
    %157 = math.log %156 : vector<8x128xf32>
    %158 = arith.mulf %109, %18 : vector<8x128xf32>
    %cst_85 = arith.constant 1.000000e-16 : f32
    %159 = vector.broadcast %cst_85 : f32 to vector<8x128xf32>
    %160 = arith.addf %159, %158 : vector<8x128xf32>
    %161 = math.log %160 : vector<8x128xf32>
    %162 = arith.subf %77, %100 : vector<8x128xf32>
    %163 = arith.mulf %162, %162 : vector<8x128xf32>
    %164 = arith.subf %87, %103 : vector<8x128xf32>
    %165 = arith.mulf %164, %164 : vector<8x128xf32>
    %166 = arith.addf %163, %165 : vector<8x128xf32>
    %167 = arith.subf %90, %157 : vector<8x128xf32>
    %168 = arith.mulf %167, %167 : vector<8x128xf32>
    %169 = arith.addf %166, %168 : vector<8x128xf32>
    %170 = arith.subf %93, %161 : vector<8x128xf32>
    %171 = arith.mulf %170, %170 : vector<8x128xf32>
    %172 = arith.addf %169, %171 : vector<8x128xf32>
    %c0_86 = arith.constant 0 : index
    %c5_87 = arith.constant 5 : index
    %173 = arith.index_cast %41 : i32 to index
    %c0_88 = arith.constant 0 : index
    %174 = vector.load %arg5[%c0_86, %c5_87, %173, %c0_88] : memref<1x6x8x128xf32, #tpu.memory_space<vmem>>, vector<1x1x8x128xf32>
    %175 = vector.shape_cast %174 : vector<1x1x8x128xf32> to vector<8x128xf32>
    %c0_89 = arith.constant 0 : index
    %c5_90 = arith.constant 5 : index
    %176 = arith.index_cast %41 : i32 to index
    %c0_91 = arith.constant 0 : index
    %177 = vector.load %arg4[%c0_89, %c5_90, %176, %c0_91] : memref<1x9x8x128xf32, #tpu.memory_space<vmem>>, vector<1x1x8x128xf32>
    %178 = vector.shape_cast %177 : vector<1x1x8x128xf32> to vector<8x128xf32>
    %c0_92 = arith.constant 0 : index
    %c6 = arith.constant 6 : index
    %179 = arith.index_cast %41 : i32 to index
    %c0_93 = arith.constant 0 : index
    %180 = vector.load %arg4[%c0_92, %c6, %179, %c0_93] : memref<1x9x8x128xf32, #tpu.memory_space<vmem>>, vector<1x1x8x128xf32>
    %181 = vector.shape_cast %180 : vector<1x1x8x128xf32> to vector<8x128xf32>
    %182 = arith.maximumf %178, %181 : vector<8x128xf32>
    %c0_94 = arith.constant 0 : index
    %c7 = arith.constant 7 : index
    %183 = arith.index_cast %41 : i32 to index
    %c0_95 = arith.constant 0 : index
    %184 = vector.load %arg4[%c0_94, %c7, %183, %c0_95] : memref<1x9x8x128xf32, #tpu.memory_space<vmem>>, vector<1x1x8x128xf32>
    %185 = vector.shape_cast %184 : vector<1x1x8x128xf32> to vector<8x128xf32>
    %186 = arith.maximumf %182, %185 : vector<8x128xf32>
    %c0_96 = arith.constant 0 : index
    %c8 = arith.constant 8 : index
    %187 = arith.index_cast %41 : i32 to index
    %c0_97 = arith.constant 0 : index
    %188 = vector.load %arg4[%c0_96, %c8, %187, %c0_97] : memref<1x9x8x128xf32, #tpu.memory_space<vmem>>, vector<1x1x8x128xf32>
    %189 = vector.shape_cast %188 : vector<1x1x8x128xf32> to vector<8x128xf32>
    %190 = arith.maximumf %186, %189 : vector<8x128xf32>
    %c0_98 = arith.constant 0 : index
    %c5_99 = arith.constant 5 : index
    %191 = arith.index_cast %41 : i32 to index
    %c0_100 = arith.constant 0 : index
    %192 = vector.load %arg4[%c0_98, %c5_99, %191, %c0_100] : memref<1x9x8x128xf32, #tpu.memory_space<vmem>>, vector<1x1x8x128xf32>
    %193 = vector.shape_cast %192 : vector<1x1x8x128xf32> to vector<8x128xf32>
    %194 = arith.subf %193, %190 : vector<8x128xf32>
    %195 = math.exp %194 : vector<8x128xf32>
    %cst_101 = arith.constant 0.000000e+00 : f32
    %196 = vector.broadcast %cst_101 : f32 to vector<8x128xf32>
    %197 = arith.cmpf oeq, %175, %196 : vector<8x128xf32>
    %c0_102 = arith.constant 0 : index
    %c5_103 = arith.constant 5 : index
    %198 = arith.index_cast %41 : i32 to index
    %c0_104 = arith.constant 0 : index
    %199 = vector.load %arg4[%c0_102, %c5_103, %198, %c0_104] : memref<1x9x8x128xf32, #tpu.memory_space<vmem>>, vector<1x1x8x128xf32>
    %200 = vector.shape_cast %199 : vector<1x1x8x128xf32> to vector<8x128xf32>
    %cst_105 = arith.constant 0.000000e+00 : f32
    %201 = vector.broadcast %cst_105 : f32 to vector<8x128xf32>
    %202 = arith.select %197, %200, %201 : vector<8x128xi1>, vector<8x128xf32>
    %c0_106 = arith.constant 0 : index
    %c6_107 = arith.constant 6 : index
    %203 = arith.index_cast %41 : i32 to index
    %c0_108 = arith.constant 0 : index
    %204 = vector.load %arg4[%c0_106, %c6_107, %203, %c0_108] : memref<1x9x8x128xf32, #tpu.memory_space<vmem>>, vector<1x1x8x128xf32>
    %205 = vector.shape_cast %204 : vector<1x1x8x128xf32> to vector<8x128xf32>
    %206 = arith.subf %205, %190 : vector<8x128xf32>
    %207 = math.exp %206 : vector<8x128xf32>
    %208 = arith.addf %195, %207 : vector<8x128xf32>
    %cst_109 = arith.constant 1.000000e+00 : f32
    %209 = vector.broadcast %cst_109 : f32 to vector<8x128xf32>
    %210 = arith.cmpf oeq, %175, %209 : vector<8x128xf32>
    %cst_110 = arith.constant 0.000000e+00 : f32
    %211 = vector.broadcast %cst_110 : f32 to vector<8x128xf32>
    %212 = arith.select %210, %205, %211 : vector<8x128xi1>, vector<8x128xf32>
    %213 = arith.addf %202, %212 : vector<8x128xf32>
    %c0_111 = arith.constant 0 : index
    %c7_112 = arith.constant 7 : index
    %214 = arith.index_cast %41 : i32 to index
    %c0_113 = arith.constant 0 : index
    %215 = vector.load %arg4[%c0_111, %c7_112, %214, %c0_113] : memref<1x9x8x128xf32, #tpu.memory_space<vmem>>, vector<1x1x8x128xf32>
    %216 = vector.shape_cast %215 : vector<1x1x8x128xf32> to vector<8x128xf32>
    %217 = arith.subf %216, %190 : vector<8x128xf32>
    %218 = math.exp %217 : vector<8x128xf32>
    %219 = arith.addf %208, %218 : vector<8x128xf32>
    %cst_114 = arith.constant 2.000000e+00 : f32
    %220 = vector.broadcast %cst_114 : f32 to vector<8x128xf32>
    %221 = arith.cmpf oeq, %175, %220 : vector<8x128xf32>
    %cst_115 = arith.constant 0.000000e+00 : f32
    %222 = vector.broadcast %cst_115 : f32 to vector<8x128xf32>
    %223 = arith.select %221, %216, %222 : vector<8x128xi1>, vector<8x128xf32>
    %224 = arith.addf %213, %223 : vector<8x128xf32>
    %c0_116 = arith.constant 0 : index
    %c8_117 = arith.constant 8 : index
    %225 = arith.index_cast %41 : i32 to index
    %c0_118 = arith.constant 0 : index
    %226 = vector.load %arg4[%c0_116, %c8_117, %225, %c0_118] : memref<1x9x8x128xf32, #tpu.memory_space<vmem>>, vector<1x1x8x128xf32>
    %227 = vector.shape_cast %226 : vector<1x1x8x128xf32> to vector<8x128xf32>
    %228 = arith.subf %227, %190 : vector<8x128xf32>
    %229 = math.exp %228 : vector<8x128xf32>
    %230 = arith.addf %219, %229 : vector<8x128xf32>
    %cst_119 = arith.constant 3.000000e+00 : f32
    %231 = vector.broadcast %cst_119 : f32 to vector<8x128xf32>
    %232 = arith.cmpf oeq, %175, %231 : vector<8x128xf32>
    %cst_120 = arith.constant 0.000000e+00 : f32
    %233 = vector.broadcast %cst_120 : f32 to vector<8x128xf32>
    %234 = arith.select %232, %227, %233 : vector<8x128xi1>, vector<8x128xf32>
    %235 = arith.addf %224, %234 : vector<8x128xf32>
    %236 = math.log %230 : vector<8x128xf32>
    %237 = arith.addf %236, %190 : vector<8x128xf32>
    %238 = arith.subf %237, %235 : vector<8x128xf32>
    %cst_121 = arith.constant 0.000000e+00 : f32
    %239 = vector.broadcast %cst_121 : f32 to vector<8x128xf32>
    %240 = arith.select %56, %67, %239 : vector<8x128xi1>, vector<8x128xf32>
    %241 = arith.addf %29, %240 : vector<8x128xf32>
    %242 = arith.extui %56 : vector<8x128xi1> to vector<8x128xi32>
    %243 = arith.sitofp %242 : vector<8x128xi32> to vector<8x128xf32>
    %244 = arith.addf %31, %243 : vector<8x128xf32>
    %245 = arith.mulf %59, %153 : vector<8x128xf32>
    %246 = arith.subf %67, %245 : vector<8x128xf32>
    %cst_122 = arith.constant 0.000000e+00 : f32
    %247 = vector.broadcast %cst_122 : f32 to vector<8x128xf32>
    %248 = arith.select %53, %246, %247 : vector<8x128xi1>, vector<8x128xf32>
    %249 = arith.addf %33, %248 : vector<8x128xf32>
    %250 = arith.extui %53 : vector<8x128xi1> to vector<8x128xi32>
    %251 = arith.sitofp %250 : vector<8x128xi32> to vector<8x128xf32>
    %252 = arith.addf %35, %251 : vector<8x128xf32>
    %cst_123 = arith.constant 0.000000e+00 : f32
    %253 = vector.broadcast %cst_123 : f32 to vector<8x128xf32>
    %254 = arith.select %53, %172, %253 : vector<8x128xi1>, vector<8x128xf32>
    %255 = arith.addf %37, %254 : vector<8x128xf32>
    %cst_124 = arith.constant 0.000000e+00 : f32
    %256 = vector.broadcast %cst_124 : f32 to vector<8x128xf32>
    %257 = arith.select %53, %238, %256 : vector<8x128xi1>, vector<8x128xf32>
    %258 = arith.addf %39, %257 : vector<8x128xf32>
    %c1_i32_125 = arith.constant 1 : i32
    %c0_126 = arith.constant 0 : index
    %c0_127 = arith.constant 0 : index
    %c0_128 = arith.constant 0 : index
    %259 = vector.load %arg7[%c0_126, %c0_127, %c0_128] : memref<6x8x128xf32, #tpu.memory_space<vmem>>, vector<1x8x128xf32>
    %260 = vector.shape_cast %259 : vector<1x8x128xf32> to vector<8x128xf32>
    %261 = vector.shape_cast %241 : vector<8x128xf32> to vector<1x8x128xf32>
    tpu.vector_store %arg7[%c0_126, %c0_127, %c0_128], %261 {strides = array<i32>} : memref<6x8x128xf32, #tpu.memory_space<vmem>>, vector<1x8x128xf32>,
    %c1_129 = arith.constant 1 : index
    %c0_130 = arith.constant 0 : index
    %c0_131 = arith.constant 0 : index
    %262 = vector.load %arg7[%c1_129, %c0_130, %c0_131] : memref<6x8x128xf32, #tpu.memory_space<vmem>>, vector<1x8x128xf32>
    %263 = vector.shape_cast %262 : vector<1x8x128xf32> to vector<8x128xf32>
    %264 = vector.shape_cast %244 : vector<8x128xf32> to vector<1x8x128xf32>
    tpu.vector_store %arg7[%c1_129, %c0_130, %c0_131], %264 {strides = array<i32>} : memref<6x8x128xf32, #tpu.memory_space<vmem>>, vector<1x8x128xf32>,
    %c2_132 = arith.constant 2 : index
    %c0_133 = arith.constant 0 : index
    %c0_134 = arith.constant 0 : index
    %265 = vector.load %arg7[%c2_132, %c0_133, %c0_134] : memref<6x8x128xf32, #tpu.memory_space<vmem>>, vector<1x8x128xf32>
    %266 = vector.shape_cast %265 : vector<1x8x128xf32> to vector<8x128xf32>
    %267 = vector.shape_cast %249 : vector<8x128xf32> to vector<1x8x128xf32>
    tpu.vector_store %arg7[%c2_132, %c0_133, %c0_134], %267 {strides = array<i32>} : memref<6x8x128xf32, #tpu.memory_space<vmem>>, vector<1x8x128xf32>,
    %c3_135 = arith.constant 3 : index
    %c0_136 = arith.constant 0 : index
    %c0_137 = arith.constant 0 : index
    %268 = vector.load %arg7[%c3_135, %c0_136, %c0_137] : memref<6x8x128xf32, #tpu.memory_space<vmem>>, vector<1x8x128xf32>
    %269 = vector.shape_cast %268 : vector<1x8x128xf32> to vector<8x128xf32>
    %270 = vector.shape_cast %252 : vector<8x128xf32> to vector<1x8x128xf32>
    tpu.vector_store %arg7[%c3_135, %c0_136, %c0_137], %270 {strides = array<i32>} : memref<6x8x128xf32, #tpu.memory_space<vmem>>, vector<1x8x128xf32>,
    %c4_138 = arith.constant 4 : index
    %c0_139 = arith.constant 0 : index
    %c0_140 = arith.constant 0 : index
    %271 = vector.load %arg7[%c4_138, %c0_139, %c0_140] : memref<6x8x128xf32, #tpu.memory_space<vmem>>, vector<1x8x128xf32>
    %272 = vector.shape_cast %271 : vector<1x8x128xf32> to vector<8x128xf32>
    %273 = vector.shape_cast %255 : vector<8x128xf32> to vector<1x8x128xf32>
    tpu.vector_store %arg7[%c4_138, %c0_139, %c0_140], %273 {strides = array<i32>} : memref<6x8x128xf32, #tpu.memory_space<vmem>>, vector<1x8x128xf32>,
    %c5_141 = arith.constant 5 : index
    %c0_142 = arith.constant 0 : index
    %c0_143 = arith.constant 0 : index
    %274 = vector.load %arg7[%c5_141, %c0_142, %c0_143] : memref<6x8x128xf32, #tpu.memory_space<vmem>>, vector<1x8x128xf32>
    %275 = vector.shape_cast %274 : vector<1x8x128xf32> to vector<8x128xf32>
    %276 = vector.shape_cast %258 : vector<8x128xf32> to vector<1x8x128xf32>
    tpu.vector_store %arg7[%c5_141, %c0_142, %c0_143], %276 {strides = array<i32>} : memref<6x8x128xf32, #tpu.memory_space<vmem>>, vector<1x8x128xf32>,
    %c0_i32_144 = arith.constant 0 : i32
    %277 = arith.cmpi eq, %arg2, %c0_i32_144 : i32
    %278 = arith.extui %277 : i1 to i32
    %c0_i32_145 = arith.constant 0 : i32
    %279 = arith.cmpi ne, %278, %c0_i32_145 : i32
    scf.if %279 {
      %280 = vector.shape_cast %241 : vector<8x128xf32> to vector<1x8x128xf32>
      %cst_146 = arith.constant dense<0.000000e+00> : vector<1xf32>
      %281 = vector.multi_reduction <add>, %280, %cst_146 [1, 2] : vector<1x8x128xf32> to vector<1xf32>
      %282 = vector.shape_cast %281 : vector<1xf32> to vector<1x1x1xf32>
      %283 = vector.extract %282[0, 0, 0] : f32 from vector<1x1x1xf32>
      %284 = vector.broadcast %283 : f32 to vector<1x1xf32>
      %285 = vector.shape_cast %244 : vector<8x128xf32> to vector<1x8x128xf32>
      %cst_147 = arith.constant dense<0.000000e+00> : vector<1xf32>
      %286 = vector.multi_reduction <add>, %285, %cst_147 [1, 2] : vector<1x8x128xf32> to vector<1xf32>
      %287 = vector.shape_cast %286 : vector<1xf32> to vector<1x1x1xf32>
      %288 = vector.extract %287[0, 0, 0] : f32 from vector<1x1x1xf32>
      %289 = vector.broadcast %288 : f32 to vector<1x1xf32>
      %290 = vector.shape_cast %249 : vector<8x128xf32> to vector<1x8x128xf32>
      %cst_148 = arith.constant dense<0.000000e+00> : vector<1xf32>
      %291 = vector.multi_reduction <add>, %290, %cst_148 [1, 2] : vector<1x8x128xf32> to vector<1xf32>
      %292 = vector.shape_cast %291 : vector<1xf32> to vector<1x1x1xf32>
      %293 = vector.extract %292[0, 0, 0] : f32 from vector<1x1x1xf32>
      %294 = vector.broadcast %293 : f32 to vector<1x1xf32>
      %295 = vector.shape_cast %252 : vector<8x128xf32> to vector<1x8x128xf32>
      %cst_149 = arith.constant dense<0.000000e+00> : vector<1xf32>
      %296 = vector.multi_reduction <add>, %295, %cst_149 [1, 2] : vector<1x8x128xf32> to vector<1xf32>
      %297 = vector.shape_cast %296 : vector<1xf32> to vector<1x1x1xf32>
      %298 = vector.extract %297[0, 0, 0] : f32 from vector<1x1x1xf32>
      %299 = vector.broadcast %298 : f32 to vector<1x1xf32>
      %300 = vector.shape_cast %255 : vector<8x128xf32> to vector<1x8x128xf32>
      %cst_150 = arith.constant dense<0.000000e+00> : vector<1xf32>
      %301 = vector.multi_reduction <add>, %300, %cst_150 [1, 2] : vector<1x8x128xf32> to vector<1xf32>
      %302 = vector.shape_cast %301 : vector<1xf32> to vector<1x1x1xf32>
      %303 = vector.extract %302[0, 0, 0] : f32 from vector<1x1x1xf32>
      %304 = vector.broadcast %303 : f32 to vector<1x1xf32>
      %305 = vector.shape_cast %258 : vector<8x128xf32> to vector<1x8x128xf32>
      %cst_151 = arith.constant dense<0.000000e+00> : vector<1xf32>
      %306 = vector.multi_reduction <add>, %305, %cst_151 [1, 2] : vector<1x8x128xf32> to vector<1xf32>
      %307 = vector.shape_cast %306 : vector<1xf32> to vector<1x1x1xf32>
      %308 = vector.extract %307[0, 0, 0] : f32 from vector<1x1x1xf32>
      %309 = vector.broadcast %308 : f32 to vector<1x1xf32>
      %310 = tpu.concatenate %284, %289, %294, %299, %304, %309 in 1 : vector<1x1xf32>, vector<1x1xf32>, vector<1x1xf32>, vector<1x1xf32>, vector<1x1xf32>, vector<1x1xf32> -> vector<1x6xf32>
      %c0_152 = arith.constant 0 : index
      %c0_153 = arith.constant 0 : index
      %c0_154 = arith.constant 0 : index
      %c0_155 = arith.constant 0 : index
      %311 = vector.load %arg6[%c0_152, %c0_153, %c0_154, %c0_155] : memref<1x1x1x6xf32, #tpu.memory_space<vmem>>, vector<1x1x1x6xf32>
      %312 = vector.shape_cast %311 : vector<1x1x1x6xf32> to vector<1x6xf32>
      %313 = vector.shape_cast %310 : vector<1x6xf32> to vector<1x1x1x6xf32>
      tpu.vector_store %arg6[%c0_152, %c0_153, %c0_154, %c0_155], %313 {strides = array<i32>} : memref<1x1x1x6xf32, #tpu.memory_space<vmem>>, vector<1x1x1x6xf32>,
    } else {
    }
    return
  }
  func.func @transform_0(%arg0: i32, %arg1: i32, %arg2: i32) -> (i32, i32, i32, i32) {
    %c0_i32 = arith.constant 0 : i32
    %c0_i32_0 = arith.constant 0 : i32
    %c0_i32_1 = arith.constant 0 : i32
    %c0_i32_2 = arith.constant 0 : i32
    return %arg1, %c0_i32, %c0_i32_0, %c0_i32_1 : i32, i32, i32, i32
  }
  func.func @transform_1(%arg0: i32, %arg1: i32, %arg2: i32) -> (i32, i32, i32, i32) {
    %c1_i32 = arith.constant 1 : i32
    %0 = arith.muli %arg0, %c1_i32 : i32
    %1 = arith.addi %0, %arg2 : i32
    %c0_i32 = arith.constant 0 : i32
    %c0_i32_0 = arith.constant 0 : i32
    %c0_i32_1 = arith.constant 0 : i32
    return %arg1, %c0_i32, %1, %c0_i32_0 : i32, i32, i32, i32
  }
  func.func @transform_2(%arg0: i32, %arg1: i32, %arg2: i32) -> (i32, i32, i32, i32) {
    %c1_i32 = arith.constant 1 : i32
    %0 = arith.muli %arg0, %c1_i32 : i32
    %1 = arith.addi %0, %arg2 : i32
    %c0_i32 = arith.constant 0 : i32
    %c0_i32_0 = arith.constant 0 : i32
    %c0_i32_1 = arith.constant 0 : i32
    return %arg1, %c0_i32, %1, %c0_i32_0 : i32, i32, i32, i32
  }
  func.func @transform_3(%arg0: i32, %arg1: i32, %arg2: i32) -> (i32, i32, i32, i32) {
    %c0_i32 = arith.constant 0 : i32
    %c0_i32_0 = arith.constant 0 : i32
    %c0_i32_1 = arith.constant 0 : i32
    return %arg0, %arg1, %c0_i32, %c0_i32_0 : i32, i32, i32, i32
  }
}

</mosaic_0001>

<bundles_post_ra>
// kernel: tpu_custom_call.1
= control target key start
LH: loop header
LB: loop body
LE: loop exit
PB: predicated region body
PF: predicated region fallthrough
CT: control target
= control target key end

     0   :  { %s1402_s0 = inlined_call_operand.hbm [shape: f32[3,4,1,128], index: 0, kind: input, shape index: {}]   ;;  %s1403_s1 = inlined_call_operand.hbm [shape: f32[3,9,8,128], index: 1, kind: input, shape index: {}]   ;;  %s1404_s2 = inlined_call_operand.hbm [shape: f32[3,6,8,128], index: 2, kind: input, shape index: {}]   ;;  %s1405_s3 = inlined_call_operand.hbm [shape: f32[1,3,1,6], index: 3, kind: output, shape index: {}]  }
   0x1   :  { %1410 = sst [smem:[#allocation16_spill]] %s1402_s0 }
   0x2   :  { %1411 = sst [smem:[#allocation17_spill]] %s1403_s1 }
   0x3   :  { %8 = vsyncpa [#allocation4], 0 }
   0x4   :  { %10 = vsyncpa [#allocation4 + $0x1], 0 }
   0x5   :  { %11 = vsyncpa [#allocation7], 0 }
   0x6   :  { %13 = vsyncpa [#allocation7 + $0x1], 0 }
   0x7   :  { %14 = vsyncpa [#allocation5], 0 }
   0x8   :  { %16 = vsyncpa [#allocation5 + $0x1], 0  ;;  %s1127_s12 = smov 0   ;;  %s1129_s13 = smov 0  }
   0x9   :  { %s1131_s14 = smov 0   ;;  %s1133_s15 = smov 0  }
   0xa   :  { %s1135_s16 = smov 0   ;;  %s1137_s17 = smov 0  }
   0xb LB: > { %1412 = sst [smem:[#allocation13_spill]] %s1084_s14  ;;  %s1158_s18 = sadd.s32 4294967295, %s1096_s17   ;;  %s1096_s17 = sphi %s1137_s17, %s22_s17   ;;  %s1092_s16 = sphi %s1135_s16, %s1435_s16   ;;  %s1088_s15 = sphi %s1133_s15, %s1434_s15   ;;  %s1084_s14 = sphi %s1131_s14, %s1430_s14   ;;  %s1080_s13 = sphi %s1129_s13, %s1433_s13   ;;  %s1076_s12 = sphi %s1127_s12, %s1432_s12  }
   0xc   : > { %s769_s19 = sadd.s32 4294967294, %s1096_s17   ;;  %s37_s20 = sadd.s32 1, %s1092_s16 }
   0xd   : > { %s48_s21 = sadd.s32 1, %s1084_s14  ;;  %p39_p0 = scmp.ge.s32.totalorder %s37_s20, 3 }
   0xe   : > { %p55_p1 = scmp.ne.s32.totalorder %s1084_s14, %s1080_s13  ;;  %p56_p2 = scmp.eq.s32.totalorder %s1096_s17, 0 }
   0xf   : > { %p61_p3 = scmp.ne.s32.totalorder %s1080_s13, %s1076_s12  ;;  %s1437_s20 = smov (%p39_p0, %s37_s20), 0 }
  0x10   : > { %1413 = sst [smem:[#allocation14_spill]] %s1437_s20  ;;  %p1170_p4 = por %p56_p2, %p55_p1 }
  0x11   : > { %p62_p5 = scmp.eq.s32.totalorder %s1158_s18, 0  ;;  %s45_s23 = ssub.s32 %s1092_s16, %s1437_s20 }
  0x12   : > { %p147_p6 = scmp.eq.s32.totalorder %s1158_s18, 2  ;;  %p46_p7 = scmp.eq.s32.totalorder %s45_s23, 0 }
  0x13   : > { %p1178_p8 = por %p62_p5, %p61_p3  ;;  %p153_p10 = scmp.eq.s32.totalorder %s769_s19, 2 }
  0x14   : > { %p1182_p9 = por %p147_p6, %p55_p1  ;;  %p845_p12 = scmp.lt.s32.totalorder %s1096_s17, 3 }
  0x15   : > { %s1187_s26 = scalar_select %p46_p7, %s1084_s14, %s48_s21  }
  0x16   : > { %p1189_p11 = por %p153_p10, %p61_p3  ;;  %s1195_s28 = sand.u32 1, %s1084_s14  }
  0x17   : > { %1417 = sst [smem:[#allocation15_spill]] %s1187_s26  ;;  %s194_s29 = sand.u32 1, %s1096_s17  }
  0x18   : > { %s805_s30 = smul.u32 72, %s1195_s28  ;;  %p1201_p13 = pnand %p845_p12, %p1170_p4 }
  0x19   : > { %s806_s5 = smul.u32 1152, %s1092_s16  ;;  %s1420_s1 = sld [smem:[#allocation17_spill]] }
  0x1a   : > { %s198_s6 = scalar_lea.vmem [#allocation6], %s805_s30  ;;  %s1209_s11 = scalar_lea.sflag [#allocation7], %s194_s29 }
  0x1b   : > { %s207_s7 = sshll.u32 %s198_s6, 4  ;;  %p930_p0 = pneg %p1201_p13  ;;  %s208_s7 = int_to_ptr.vmem [resolvable:$true] %s207_s7 }
  0x1c   : > { %s941_s19 = scalar_lea.vmem %s208_s7, 1152  ;;  %s1098_s21 = smov [#allocation6]  }
  0x1d   : > { %p942_p1 = scmp.ne.s32.totalorder %s208_s7, %s941_s19  ;;  %s946_s22 = sshll.u32 %s1098_s21, 4  ;;  %s947_s22 = int_to_ptr.vmem [resolvable:$false] %s946_s22 }
  0x1e   : > { %s948_s23 = scalar_lea.vmem %s947_s22, 2304  ;;  %p949_p4 = scmp.lt.s32.totalorder %s208_s7, %s947_s22 }
  0x1f   : > { %s206_s10 = scalar_lea.hbm %s1420_s1, %s806_s5  ;;  %p944_p2 = pnand %p942_p1, %p930_p0 }
  0x20   : > { %p950_p5 = scmp.lt.s32.totalorder %s948_s23, %s941_s19 }
  0x21   : > { %p945_p3 = pneg %p944_p2 }
  0x22   : > { %p951_p6 = por %p950_p5, %p949_p4 }
  0x24   : > { %p952_p7 = pnand %p951_p6, %p945_p3 }
  0x26   : > { %955 = shalt.err (!%p952_p7)
}
  0x27   : > { %s1407_s30 = smov 128   ;;  %s1408_s29 = smov 8  }
  0x28   : > { %837 = dma.hbm_to_vmem [thread:$0]  (!%p1201_p13), %s206_s10, 1152, %s208_s7, %s1209_s11, %s1407_s30, %s1407_s30, %s1408_s29  }
  0x29   : > { %p777_p10 = scmp.ge.s32.totalorder %s1096_s17, 1  ;;  %p238_p12 = scmp.lt.s32.totalorder %s1096_s17, 4 }
  0x2a   : > { %s772_s6 = sshll.u32 %s1195_s28, 2  ;;  %s804_s8 = sshll.u32 %s1092_s16, 6 }
  0x2b   : > { %p1224_p1 = pnand %p777_p10, %p238_p12  ;;  %s1422_s0 = sld [smem:[#allocation16_spill]] }
  0x2c   : > { %s177_s22 = scalar_lea.vmem [#allocation3], %s772_s6  ;;  %s174_s1 = scalar_lea.sflag [#allocation4], %s1195_s28 }
  0x2d   : > { %s184_s23 = sshll.u32 %s177_s22, 4  ;;  %s1101_s7 = smov [#allocation3]   ;;  %s185_s23 = int_to_ptr.vmem [resolvable:$true] %s184_s23 }
  0x2e   : > { %s969_s20 = scalar_lea.vmem %s185_s23, 64  ;;  %s974_s10 = sshll.u32 %s1101_s7, 4  ;;  %s975_s10 = int_to_ptr.vmem [resolvable:$false] %s974_s10 }
  0x2f   : > { %p970_p2 = scmp.ne.s32.totalorder %s185_s23, %s969_s20  ;;  %s976_s30 = scalar_lea.vmem %s975_s10, 128 }
  0x30   : > { %p977_p5 = scmp.lt.s32.totalorder %s185_s23, %s975_s10  ;;  %p978_p6 = scmp.lt.s32.totalorder %s976_s30, %s969_s20 }
  0x31   : > { %s183_s21 = scalar_lea.hbm %s1422_s0, %s804_s8  ;;  %p972_p3 = pnand %p970_p2, %p930_p0 }
  0x32   : > { %p979_p7 = por %p978_p6, %p977_p5 }
  0x33   : > { %p973_p4 = pneg %p972_p3 }
  0x35   : > { %p980_p10 = pnand %p979_p7, %p973_p4 }
  0x37   : > { %983 = shalt.err (!%p980_p10)
}
  0x38   : > { %s1102_s8 = smov 16   ;;  %s1103_s6 = smov 1  }
  0x39   : > { %834 = dma.hbm_to_vmem [thread:$0]  (!%p1201_p13), %s183_s21, 64, %s185_s23, %s174_s1, %s1102_s8, %s1102_s8, %s1103_s6  }
  0x3a   : > { %s807_s9 = smul.u32 48, %s1195_s28  ;;  %s1104_s30 = smov [#allocation8]  }
  0x3b   : > { %s808_s19 = smul.u32 768, %s1092_s16  ;;  %s1002_s26 = sshll.u32 %s1104_s30, 4  ;;  %s1003_s26 = int_to_ptr.vmem [resolvable:$false] %s1002_s26 }
  0x3c   : > { %s221_s0 = scalar_lea.vmem [#allocation8], %s807_s9  ;;  %s1004_s14 = scalar_lea.vmem %s1003_s26, 1536 }
  0x3d   : > { %s229_s7 = scalar_lea.hbm %s1404_s2, %s808_s19  ;;  %s230_s10 = sshll.u32 %s221_s0, 4  ;;  %s231_s10 = int_to_ptr.vmem [resolvable:$true] %s230_s10 }
  0x3e   : > { %s997_s20 = scalar_lea.vmem %s231_s10, 768  ;;  %p1005_p4 = scmp.lt.s32.totalorder %s231_s10, %s1003_s26 }
  0x3f   : > { %p998_p12 = scmp.ne.s32.totalorder %s231_s10, %s997_s20  ;;  %p1006_p5 = scmp.lt.s32.totalorder %s1004_s14, %s997_s20 }
  0x41   : > { %p1000_p2 = pnand %p998_p12, %p930_p0  ;;  %p1007_p6 = por %p1006_p5, %p1005_p4 }
  0x43   : > { %p1001_p3 = pneg %p1000_p2 }
  0x45   : > { %p1008_p7 = pnand %p1007_p6, %p1001_p3 }
  0x47   : > { %1011 = shalt.err (!%p1008_p7)
}
  0x48   : > { %s1423_s1 = smov 8   ;;  %s1424_s0 = smov 128  }
  0x49   : > { %840 = dma.hbm_to_vmem [thread:$0]  (!%p1201_p13), %s229_s7, 768, %s231_s10, %s1209_s11, %s1424_s0, %s1424_s0, %s1423_s1  }
  0x4a   : > { %242 = sbr.rel (%p1224_p1) target bundleno = 364 (0x16c), region = 32  ;;  %s1256_s28 = sand.u32 (!%p1224_p1), 1, %s1080_s13  }
  0x4b   : > { %s778_s14 = sshll.u32 (!%p1224_p1), %s1256_s28, 2  ;;  %s245_s26 = scalar_lea.sflag (!%p1224_p1), [#allocation4], %s1256_s28 }
  0x4c   : > { %s1260_s29 = scalar_lea.vmem (!%p1224_p1), [#allocation3], %s778_s14 }
  0x4f   : > { %1063 = dma.done.wait (%p1178_p8), %s245_s26, 64  }
  0x50   : > { %1065 = vsyncadd (%p1178_p8), %s245_s26, 4294967232  ;;  %s253_s4 = sand.u32 1, %s1158_s18   ;;  %s809_s11 = smul.u32 72, %s1256_s28 }
  0x51   : > { %s254_s5 = scalar_lea.sflag [#allocation7], %s253_s4 }
  0x52   : > { %s1268_s21 = scalar_lea.vmem [#allocation6], %s809_s11 }
  0x53   : > { %1067 = dma.done.wait (%p1178_p8), %s254_s5, 1920  }
  0x54   : > { %1069 = vsyncadd (%p1178_p8), %s254_s5, 4294965376  ;;  %v341_v0 = vlaneseq  ;;  %s810_s23 = smul.u32 48, %s1256_s28  ;;  %v1279_v6 = vld [vmem:[%s1268_s21] sm:$0xff]  ;;  %v783_v7 = vld [vmem:[%s1260_s29 + $0x2] ss:$0 sm:$0xff]  ;;  %v1105_v12 = vmov 0.0  }
  0x55   : > { %v372_v9 = vand.u32 2147483647, %v1279_v6  ;;  %v786_v10 = vld [vmem:[%s1268_s21 + $0x8] sm:$0xff]  ;;  %v787_v11 = vld [vmem:[%s1268_s21 + $0x10] sm:$0xff]  ;;  %v1296_v17 = vld [vmem:[%s1268_s21 + $0x18] sm:$0xff]  ;;  %vm600_vm10 = vcmask 7168  }
  0x56   : > { %v342_v1 = vshrl.u32 %v341_v0, 7  ;;  %v344_v2 = vand.u32 127, %v341_v0  ;;  %s1275_s18 = scalar_lea.vmem [#allocation8], %s810_s23  ;;  %v389_v15 = vmul.f32 0.5, %v786_v10  ;;  %v396_v16 = vmul.f32 0.5, %v787_v11  ;;  %v1299_v18 = vld [vmem:[%s1268_s21 + $0x20] sm:$0xff] }
  0x57   : > { %v365_v5 = vld [vmem:[%s1275_s18] sm:$0xff]  ;;  %v373_v19 = vsub.f32 0.0, %v372_v9  ;;  %v785_v21 = vld [vmem:[%s1260_s29 + $0x3] ss:$0 sm:$0xff]  ;;  %v406_v22 = vmul.f32 1.442695, %v1296_v17 }
  0x58   : > { %v345_v3 = vmul.u32 128, %v342_v1  ;;  %vm368_vm1 = vcmp.eq.f32.partialorder %v365_v5, 0.0  ;;  %vm366_vm2 = vcmp.eq.f32.partialorder %v365_v5, 1.0  ;;  %900 = vtanh.f32 %v389_v15  ;;  %v792_v24 = vld [vmem:[%s1275_s18 + $0x18] sm:$0xff]  ;;  %v793_v26 = vld [vmem:[%s1275_s18 + $0x20] sm:$0xff]  ;;  %v1320_v35 = vld [vmem:[%s1268_s21 + $0x40] sm:$0xff] }
  0x59   : > { %v409_v23 = vmul.f32 1.442695, %v1299_v18  ;;  %v374_v25 = vmul.f32 1.442695, %v373_v19  ;;  %902 = vtanh.f32 %v396_v16  ;;  %v449_v27 = vmul.f32 %v792_v24, %v783_v7  ;;  %v1309_v29 = vld [vmem:[%s1268_s21 + $0x28] sm:$0xff]  ;;  %v1312_v31 = vld [vmem:[%s1268_s21 + $0x30] sm:$0xff] }
  0x5a   : > { %v346_v4 = vadd.s32 %v345_v3, %v344_v2  ;;  %904 = vpow2.f32 %v406_v22  ;;  %v453_v28 = vmul.f32 %v793_v26, %v785_v21  ;;  %v1315_v33 = vld [vmem:[%s1268_s21 + $0x38] sm:$0xff]  ;;  %v476_v34 = vmax.f32 %v1309_v29, %v1312_v31  ;;  %v791_v0 = vld [vmem:[%s1275_s18 + $0x10] sm:$0xff]  ;;  %s801_s19 = sshll.u32 %s1088_s15, 4  ;;  %s297_s7 = scalar_lea.vmem [#allocation9], %s1256_s28 }
  0x5b   : > { %906 = vpow2.f32 %v374_v25  ;;  %v450_v30 = vadd.f32 1e-16, %v449_v27  ;;  %v422_v41 = vmul.f32 0.5, %v792_v24  ;;  %v779_v43 = vld [vmem:[%s1260_s29] ss:$0 sm:$0xff]  ;;  %v432_v60 = vmul.f32 0.5, %v793_v26  ;;  %s1361_s0 = scalar_lea.hbm %s1405_s3, %s801_s19 }
  0x5c   : > { %vm364_vm0 = vcmp.lt.s32.totalorder %v346_v4, 128  ;;  %908 = vpow2.f32 %v409_v23  ;;  %v454_v32 = vadd.f32 1e-16, %v453_v28  ;;  %v480_v36 = vmax.f32 %v476_v34, %v1315_v33  ;;  %v790_v48 = vld [vmem:[%s1275_s18 + $0x8] sm:$0xff]  ;;  %s627_s10 = sshll.u32 %s297_s7, 4  ;;  %s613_s15 = scalar_lea.sflag [#allocation5], %s1256_s28  ;;  %s628_s10 = int_to_ptr.vmem [resolvable:$true] %s627_s10 }
  0x5d   : > { %vm1282_vm3 = vmand %vm364_vm0, %vm368_vm1  ;;  %910 = vlog2.f32 %v450_v30  ;;  %v781_v52 = vld [vmem:[%s1260_s29 + $0x1] ss:$0 sm:$0xff]  ;;  %v423_v59 = vadd.f32 %v790_v48, %v422_v41  ;;  %v442_v61 = vmul.f32 %v793_v26, %v792_v24  ;;  %v426_v3 = vsub.f32 %v790_v48, %v422_v41  ;;  %s1012_s14 = scalar_lea.vmem %s628_s10, 16  ;;  %s1106_s26 = smov [#allocation9]  }
  0x5e   : > { %v799_v13 = vsel %vm1282_vm3, 1.0, %v1105_v12  ;;  %vm1291_vm4 = vmand %vm364_vm0, %vm366_vm2  ;;  %912 = vlog2.f32 %v454_v32  ;;  %v1324_v37 = vmax.f32 %v480_v36, %v1320_v35  ;;  %vm602_vm11 = vcmask 15360   ;;  %p1013_p8 = scmp.ne.s32.totalorder %s628_s10, %s1012_s14  ;;  %s1016_s29 = sshll.u32 %s1106_s26, 4  ;;  %s1017_s29 = int_to_ptr.vmem [resolvable:$false] %s1016_s29 }
  0x5f   : > { %550 = vadd.xlane.f32.xlu0 %v799_v13  ;;  %v800_v20 = vsel %vm1291_vm4, 1.0, %v1105_v12  ;;  %v433_v12 = vadd.f32 %v791_v0, %v432_v60  ;;  %v436_v13 = vsub.f32 %v791_v0, %v432_v60  ;;  %v443_v21 = vand.u32 2147483647, %v442_v61  ;;  %s1018_s4 = scalar_lea.vmem %s1017_s29, 32  ;;  %p1019_p1 = scmp.lt.s32.totalorder %s628_s10, %s1017_s29 }
  0x60   : > { %570 = vadd.xlane.f32.xlu1 %v800_v20  ;;  %v485_v38 = vsub.f32 %v1309_v29, %v1324_v37  ;;  %v490_v39 = vsub.f32 %v1312_v31, %v1324_v37  ;;  %v497_v40 = vsub.f32 %v1315_v33, %v1324_v37  ;;  %v504_v53 = vsub.f32 %v1320_v35, %v1324_v37  ;;  %p1014_p13 = pnand %p1013_p8, %p1182_p9  ;;  %p1020_p10 = scmp.lt.s32.totalorder %s1018_s4, %s1012_s14 }
  0x61   : > { %vm604_vm12 = vcmask 23552   ;;  %vm606_vm13 = vcmask 31744   ;;  %vm608_vm14 = vcmask 39936   ;;  %vm610_vm15 = vcmask 40960  }
  0x62   : > { %v486_v44 = vmul.f32 1.442695, %v485_v38  ;;  %v491_v45 = vmul.f32 1.442695, %v490_v39  ;;  %v498_v49 = vmul.f32 1.442695, %v497_v40  ;;  %p1015_p0 = pneg %p1014_p13  ;;  %p1021_p12 = por %p1020_p10, %p1019_p1 }
  0x63   : > { %v505_v4 = vmul.f32 1.442695, %v504_v53  ;;  %v371_v53 = vmax.f32 %v1279_v6, 0.0 }
  0x64   : > { %914 = vpow2.f32 %v486_v44  ;;  %p1022_p2 = pnand %p1021_p12, %p1015_p0 }
  0x65   : > { %v901_v42 = vpop.eup %900  ;;  %916 = vpow2.f32 %v491_v45 }
  0x66   : > { %v903_v46 = vpop.eup %902  ;;  %v391_v47 = vadd.f32 1.0, %v901_v42  ;;  %918 = vpow2.f32 %v498_v49 }
  0x67   : > { %v905_v50 = vpop.eup %904  ;;  %v398_v51 = vadd.f32 1.0, %v903_v46 }
  0x68   : > { %v907_v54 = vpop.eup %906  ;;  %v392_v55 = vmul.f32 0.5, %v391_v47  ;;  %v408_v56 = vmul.f32 %v905_v50, %v779_v43 }
  0x69   : > { %v909_v57 = vpop.eup %908  ;;  %v376_v58 = vadd.f32 1.0, %v907_v54  ;;  %v399_v63 = vmul.f32 0.5, %v398_v51  ;;  %v379_v19 = vmul.f32 -0.5, %v907_v54  ;;  %v382_v42 = vand.u32 2147483647, %v907_v54 }
  0x6a   : > { %v911_v62 = vpop.eup %910  ;;  %v411_v1 = vmul.f32 %v909_v57, %v781_v52  ;;  %v420_v2 = vmul.f32 0.5, %v408_v56  ;;  %v457_v9 = vsub.f32 %v392_v55, %v790_v48 }
  0x6b   : > { %920 = vlog2.f32 %v376_v58  ;;  %v913_v5 = vpop.eup %912  ;;  %v452_v7 = vmul.f32 0.6931472, %v911_v62  ;;  %v459_v10 = vsub.f32 %v399_v63, %v791_v0  ;;  %v380_v38 = vadd.f32 1.0, %v379_v19  ;;  %v794_v0 = vld [vmem:[%s1275_s18 + $0x28] sm:$0xff] }
  0x6c   : > { %v421_v11 = vadd.f32 %v420_v2, %v392_v55  ;;  %v425_v15 = vsub.f32 %v392_v55, %v420_v2  ;;  %v430_v16 = vmul.f32 0.5, %v411_v1  ;;  %v456_v22 = vmul.f32 0.6931472, %v913_v5 }
  0x6d   : > { %v458_v26 = vmul.f32 %v457_v9, %v457_v9  ;;  %v460_v27 = vmul.f32 %v459_v10, %v459_v10  ;;  %v462_v28 = vsub.f32 %v1296_v17, %v452_v7  ;;  %922 = vpow2.f32 %v505_v4 }
  0x6e   : > { %v424_v20 = vmin.f32 %v421_v11, %v423_v59  ;;  %v427_v23 = vmax.f32 %v425_v15, %v426_v3  ;;  %v431_v24 = vadd.f32 %v430_v16, %v399_v63  ;;  %v435_v25 = vsub.f32 %v399_v63, %v430_v16 }
  0x6f   : > { %v441_v36 = vmul.f32 %v411_v1, %v408_v56  ;;  %v461_v43 = vadd.f32 %v460_v27, %v458_v26  ;;  %v463_v44 = vmul.f32 %v462_v28, %v462_v28  ;;  %v465_v45 = vsub.f32 %v1299_v18, %v456_v22 }
  0x70   : > { %v428_v30 = vsub.f32 %v424_v20, %v427_v23  ;;  %v434_v32 = vmin.f32 %v431_v24, %v433_v12  ;;  %v437_v34 = vmax.f32 %v435_v25, %v436_v13  ;;  %v381_v17 = vmul.f32 %v907_v54, %v380_v38 }
  0x71   : > { %v915_v41 = vpop.eup %914  ;;  %v444_v48 = vadd.f32 %v443_v21, %v441_v36  ;;  %vm383_vm5 = vcmp.lt.f32.partialorder %v382_v42, 0.0004427343  ;;  %v464_v55 = vadd.f32 %v463_v44, %v461_v43  ;;  %v466_v56 = vmul.f32 %v465_v45, %v465_v45 }
  0x72   : > { %v429_v39 = vmax.f32 %v428_v30, 0.0  ;;  %v438_v40 = vsub.f32 %v434_v32, %v437_v34  ;;  %v917_v46 = vpop.eup %916  ;;  %vm488_vm6 = vcmp.eq.f32.partialorder %v794_v0, 0.0  ;;  %vm494_vm7 = vcmp.eq.f32.partialorder %v794_v0, 1.0 }
  0x73   : > { %v493_v49 = vadd.f32 %v917_v46, %v915_v41  ;;  %v919_v50 = vpop.eup %918  ;;  %v467_v62 = vadd.f32 %v466_v56, %v464_v55  ;;  %v489_v3 = vsel %vm488_vm6, %v1309_v29, 0.0  ;;  %v495_v4 = vsel %vm494_vm7, %v1312_v31, 0.0 }
  0x74   : > { %v439_v47 = vmax.f32 %v438_v40, 0.0  ;;  %vm501_vm8 = vcmp.eq.f32.partialorder %v794_v0, 2.0  ;;  %v496_v5 = vadd.f32 %v495_v4, %v489_v3  ;;  %vm508_vm9 = vcmp.eq.f32.partialorder %v794_v0, 3.0 }
  0x75   : > { %v500_v59 = vadd.f32 %v919_v50, %v493_v49  ;;  %v527_v2 = vsel %vm1291_vm4, %v467_v62, 0.0  ;;  %v502_v7 = vsel %vm501_vm8, %v1315_v33, 0.0  ;;  %v509_v11 = vsel %vm508_vm9, %v1320_v35, 0.0 }
  0x76   : > { %v440_v51 = vmul.f32 %v439_v47, %v429_v39  ;;  %v503_v9 = vadd.f32 %v502_v7, %v496_v5 }
  0x78   : > { %v921_v52 = vpop.eup %920  ;;  %v445_v58 = vsub.f32 %v444_v48, %v440_v51  ;;  %v510_v15 = vadd.f32 %v509_v11, %v503_v9 }
  0x79   : > { %v378_v57 = vmul.f32 0.6931472, %v921_v52 }
  0x7a   : > { %v446_v61 = vadd.f32 1e-06, %v445_v58  ;;  %v923_v63 = vpop.eup %922 }
  0x7b   : > { %v384_v60 = vsel %vm383_vm5, %v381_v17, %v378_v57  ;;  %v507_v1 = vadd.f32 %v923_v63, %v500_v59 }
  0x7c   : > { %v385_v18 = vadd.f32 %v384_v60, %v371_v53  ;;  %924 = vrcp.f32 %v446_v61 }
  0x7d   : > { %926 = vlog2.f32 %v507_v1 }
  0x7e   : > { %v515_v54 = vsel %vm1282_vm3, %v385_v18, 0.0 }
  0x7f   : > { %540 = vadd.xlane.f32.xlu0 %v515_v54 }
  0x83   : > { %580 = vadd.xlane.f32.xlu0 %v527_v2 }
  0x89   : > { %v925_v8 = vpop.eup %924 }
  0x8a   : > { %v448_v10 = vmul.f32 %v925_v8, %v440_v51  ;;  %v927_v12 = vpop.eup %926 }
  0x8b   : > { %v512_v16 = vmul.f32 0.6931472, %v927_v12 }
  0x8c   : > { %v520_v13 = vmul.f32 %v448_v10, %v1279_v6 }
  0x8d   : > { %v513_v29 = vadd.f32 %v512_v16, %v1324_v37 }
  0x8e   : > { %v521_v19 = vsub.f32 %v385_v18, %v520_v13 }
  0x8f   : > { %v514_v20 = vsub.f32 %v513_v29, %v510_v15 }
  0x90   : > { %v522_v31 = vsel %vm1291_vm4, %v521_v19, 0.0 }
  0x91   : > { %560 = vadd.xlane.f32.xlu1 %v522_v31  ;;  %v529_v33 = vsel %vm1291_vm4, %v514_v20, 0.0 }
  0x95   : > { %590 = vadd.xlane.f32.xlu1 %v529_v33 }
  0xe8   : > { %v551_v21 = vpop.xlane.xlu0 %550 }
  0xe9   : > { %v552_v22 = vrot.slane %v551_v21, 4  ;;  %v571_v30 = vpop.xlane.xlu1 %570 }
  0xea   : > { %v572_v38 = vrot.slane %v571_v30, 4 }
  0xeb   : > { %v553_v35 = vadd.f32 %v552_v22, %v551_v21 }
  0xec   : > { %v573_v40 = vadd.f32 %v572_v38, %v571_v30 }
  0xed   : > { %v554_v23 = vrot.slane %v553_v35, 2 }
  0xee   : > { %v574_v42 = vrot.slane %v573_v40, 2 }
  0xef   : > { %v555_v25 = vadd.f32 %v554_v23, %v553_v35 }
  0xf0   : > { %v575_v48 = vadd.f32 %v574_v42, %v573_v40 }
  0xf1   : > { %v556_v28 = vrot.slane %v555_v25, 1 }
  0xf2   : > { %v576_v53 = vrot.slane %v575_v48, 1 }
  0xf3   : > { %v557_v36 = vadd.f32 %v556_v28, %v555_v25 }
  0xf4   : > { %v577_v60 = vadd.f32 %v576_v53, %v575_v48 }
 0x108   : > { %v541_v24 = vpop.xlane.xlu0 %540 }
 0x109   : > { %v542_v6 = vrot.slane %v541_v24, 4 }
 0x10b   : > { %v543_v26 = vadd.f32 %v542_v6, %v541_v24 }
 0x10c   : > { %v581_v32 = vpop.xlane.xlu0 %580 }
 0x10d   : > { %v544_v27 = vrot.slane %v543_v26, 2  ;;  %v582_v14 = vrot.slane %v581_v32, 4 }
 0x10f   : > { %v545_v37 = vadd.f32 %v544_v27, %v543_v26  ;;  %v583_v41 = vadd.f32 %v582_v14, %v581_v32 }
 0x111   : > { %v546_v34 = vrot.slane %v545_v37, 1  ;;  %v584_v44 = vrot.slane %v583_v41, 2 }
 0x113   : > { %v547_v39 = vadd.f32 %v546_v34, %v545_v37  ;;  %v585_v49 = vadd.f32 %v584_v44, %v583_v41 }
 0x115   : > { %811 = vpush %v547_v39  ;;  %v586_v57 = vrot.slane %v585_v49, 1 }
 0x116   : > { %813 = vpush %v557_v36 }
 0x117   : > { %v587_v61 = vadd.f32 %v586_v57, %v585_v49 }
 0x11a   : > { %v561_v43 = vpop.xlane.xlu1 %560 }
 0x11b   : > { %v562_v45 = vrot.slane %v561_v43, 4 }
 0x11d   : > { %v563_v46 = vadd.f32 %v562_v45, %v561_v43 }
 0x11e   : > { %v591_v47 = vpop.xlane.xlu1 %590 }
 0x11f   : > { %v564_v50 = vrot.slane %v563_v46, 2  ;;  %v592_v17 = vrot.slane %v591_v47, 4 }
 0x121   : > { %v593_v51 = vadd.f32 %v592_v17, %v591_v47  ;;  %v565_v52 = vadd.f32 %v564_v50, %v563_v46 }
 0x123   : > { %v594_v55 = vrot.slane %v593_v51, 2  ;;  %v566_v56 = vrot.slane %v565_v52, 1 }
 0x125   : > { %v595_v58 = vadd.f32 %v594_v55, %v593_v51  ;;  %v567_v59 = vadd.f32 %v566_v56, %v565_v52 }
 0x127   : > { %815 = vpush %v567_v59  ;;  %v596_v18 = vrot.slane %v595_v58, 1 }
 0x128   : > { %817 = vpush %v577_v60 }
 0x129   : > { %819 = vpush %v587_v61  ;;  %v597_v62 = vadd.f32 %v596_v18, %v595_v58 }
 0x12b   : > { %821 = vpush %v597_v62 }
 0x146   : > { %s812_s24 = spop %811 }
 0x147   : > { %s814_s8 = spop %813  ;;  %v549_v63 = vstv %s812_s24 }
 0x148   : > { %v559_v0 = vstv %s814_s8 }
 0x149   : > { %v601_v54 = vsel %vm600_vm10, %v549_v63, %v559_v0 }
 0x158   : > { %s816_s6 = spop %815 }
 0x159   : > { %v569_v1 = vstv %s816_s6  ;;  %s818_s9 = spop %817 }
 0x15a   : > { %v603_v2 = vsel %vm602_vm11, %v601_v54, %v569_v1  ;;  %v579_v3 = vstv %s818_s9  ;;  %s820_s22 = spop %819 }
 0x15b   : > { %v605_v4 = vsel %vm604_vm12, %v603_v2, %v579_v3  ;;  %v589_v5 = vstv %s820_s22 }
 0x15c   : > { %v607_v7 = vsel %vm606_vm13, %v605_v4, %v589_v5  ;;  %s822_s20 = spop %821 }
 0x15d   : > { %v599_v8 = vstv %s822_s20 }
 0x15e   : > { %v609_v9 = vsel %vm608_vm14, %v607_v7, %v599_v8 }
 0x15f   : > { %611 = vst.msk [vmem:[%s297_s7] sm:$0x1] %vm610_vm15, %v609_v9 }
 0x160   : > { %1025 = shalt.err (!%p1022_p2)
}
 0x161   : > { %s1026_s11 = scalar_lea.hbm %s1361_s0, 16  ;;  %s1030_s21 = scalar_lea.hbm %s1405_s3, 48 }
 0x162   : > { %p1027_p3 = scmp.ne.s32.totalorder %s1361_s0, %s1026_s11  ;;  %p1031_p6 = scmp.lt.s32.totalorder %s1361_s0, %s1405_s3 }
 0x163   : > { %p1032_p7 = scmp.lt.s32.totalorder %s1030_s21, %s1026_s11 }
 0x164   : > { %p1028_p4 = pnand %p1027_p3, %p1182_p9 }
 0x165   : > { %p1033_p8 = por %p1032_p7, %p1031_p6 }
 0x166   : > { %p1029_p5 = pneg %p1028_p4 }
 0x168   : > { %p1034_p13 = pnand %p1033_p8, %p1029_p5 }
 0x16a   : > { %1037 = shalt.err (!%p1034_p13)
}
 0x16b   : > { %829 = dma.vmem_to_hbm [thread:$0]  (%p1182_p9), %s628_s10, 16, %s1361_s0, %s613_s15  }
 0x16c PF: > { %p846_p0 = scmp.ge.s32.totalorder %s1096_s17, 2  ;;  %s639_s24 = sand.u32 1, %s1076_s12  }
 0x16d   : > { %s640_s8 = scalar_lea.sflag [#allocation5], %s639_s24 }
 0x16e   : > { %p842_p1 = pnand %p846_p0, %p1189_p11 }
 0x170   : > { %p843_p10 = pneg %p842_p1 }
 0x172   : > { %1071 = dma.done.wait (%p843_p10), %s640_s8, 16  }
 0x173   : > { %1073 = vsyncadd (%p843_p10), %s640_s8, 4294967280  ;;  %s22_s17 = sadd.s32 1, %s1096_s17   ;;  %s1429_s6 = sld [smem:[#allocation13_spill]] }
 0x174   : > { %p19_p12 = scmp.ge.s32.totalorder %s22_s17, 5   ;;  %s1430_s14 = sld [smem:[#allocation15_spill]] }
 0x175   : > { %s1431_s25 = sld [smem:[#allocation14_spill]]  ;;  %s1432_s12 = smov %s1080_s13 }
 0x176   : > { %s1434_s15 = smov %s1092_s16 }
 0x177   :  { %21 = sbr.rel (!%p19_p12) target bundleno = 11 (0xb), region = 130 }
 0x179   : > { %s1433_s13 = smov %s1429_s6 }
 0x17b   : > { %s1435_s16 = smov %s1431_s25 }
 0x17c   :  { %644 = vsyncpa [#allocation4], 1 }
 0x17d   :  { %646 = vsyncpa [#allocation4 + $0x1], 1 }
 0x17e   :  { %647 = vsyncpa [#allocation7], 1 }
 0x17f   :  { %649 = vsyncpa [#allocation7 + $0x1], 1 }
 0x180   :  { %650 = vsyncpa [#allocation5], 1 }
 0x181   :  { %652 = vsyncpa [#allocation5 + $0x1], 1 }

</bundles_post_ra>
